<compile_context>
chip_gen: v7x
topology: tpu7x:2x2x1
jax: 0.10.0
libtpu: 0.0.40
codegen_flags: <defaults>
</compile_context>

<pallas_src>
import functools

import numpy as np
import jax
import jax.numpy as jnp
from jax import lax
from jax.experimental import pallas as pl
from jax.experimental.pallas import tpu as pltpu

# camera intrinsics from the reference module
FX = 804.18848168
FY = 804.18848168
CX = 128.0
CY = 128.0
INLIER_THRESH = 4.0
TEMPERATURE = 10.0
_Z_EPS = 1e-6
_T_TILE = 128          # hypotheses per grid step (lane-dense)


def _round_up(x, m):
    return ((x + m - 1) // m) * m


def _vmem_capacity_bytes():
    try:
        return int(pltpu.get_tpu_info().vmem_capacity_bytes)
    except Exception:
        return 64 * 1024 * 1024       # conservative (v7x-class) fallback


# ----------------------------------------------------------------------------
# Kernel 1: SpatialSoftArgmax2d (softmax over H*W + expected pixel coordinate)
# ----------------------------------------------------------------------------
def _soft_argmax_kernel(hm_ref, coord_ref, out_ref, *, temperature):
    # hm_ref: (rows, HW) native dtype -> f32 in-register.
    hm = hm_ref[...].astype(jnp.float32) * temperature
    m = jnp.max(hm, axis=-1, keepdims=True)             # XLU lane reduction
    e = jnp.exp(hm - m)                                  # EUP
    # One MXU NT-matmul replaces the VPU multiplies + lane reductions:
    # coord rows are [x; y; 1; 0...], so sums[:, 0:3] = [sum(e*x), sum(e*y), sum(e)].
    sums = lax.dot_general(e, coord_ref[...],
                           dimension_numbers=(((1,), (1,)), ((), ())),
                           preferred_element_type=jnp.float32)    # (rows, 8)
    # Normalize AFTER the reductions: tiny (rows, 1) reciprocal on the EUP.
    inv = pl.reciprocal(sums[:, 2:3], approx=True)
    out_ref[...] = sums * inv                            # cols 0,1 = E[x], E[y]


def spatial_soft_argmax2d(heatmaps, temperature=TEMPERATURE):
    """heatmaps: (B, K, H, W) -> (B, K, 2) pixel (x, y) expectations."""
    B, K, H, W = heatmaps.shape
    R, HW = B * K, H * W
    flat = heatmaps.reshape(R, HW)

    itemsize = jnp.dtype(flat.dtype).itemsize
    bytes_per_row_in = HW * itemsize
    bytes_per_row_f32 = HW * 4

    # Generation-aware sizing: v7x has 64 MiB VMEM per TensorCore, v5e/v6e 128 MiB.
    vmem_cap = _vmem_capacity_bytes()
    if vmem_cap <= 64 * 1024 * 1024:          # v7x-class
        per_buf_target = 6 * 1024 * 1024
        vmem_ceiling = 48 * 1024 * 1024
    else:                                     # v5e / v6e (128 MiB)
        per_buf_target = 20 * 1024 * 1024
        vmem_ceiling = 100 * 1024 * 1024

    # Row tile: multiple of 8 (no 128-row floor -> large heatmaps can't force
    # a VMEM-overflowing tile), capped at 1024 rows.
    row_tile = per_buf_target // max(bytes_per_row_in, 1)
    row_tile = max(8, min(1024, row_tile))
    row_tile -= row_tile % 8
    R8 = _round_up(R, 8)
    if R8 <= row_tile:
        # Small problem: keep >=2 grid steps so both v7x TensorCores (and the
        # DMA pipeline) get work instead of one full-extent tile on one core.
        row_tile = _round_up(max(R8 // 2, 8), 8) if R8 >= 16 else R8
    R_pad = _round_up(R8, row_tile)
    if R_pad != R:
        flat = jnp.pad(flat, ((0, R_pad - R), (0, 0)))
    n_steps = R_pad // row_tile

    # Compact pixel-coordinate table: rows [x; y; 1; 0...] with HW on lanes
    # (~HW*32 bytes in VMEM), contracted against exp(hm) on the MXU in-kernel.
    ys_np, xs_np = np.mgrid[0:H, 0:W]
    coords_np = np.zeros((8, HW), dtype=np.float32)
    coords_np[0] = xs_np.reshape(-1)
    coords_np[1] = ys_np.reshape(-1)
    coords_np[2] = 1.0
    coords = jnp.asarray(coords_np)

    # Deeper input pipelining only pays on the 128 MiB parts (v5e/v6e) with
    # long grids; v5e is the most HBM-bandwidth-bound here.
    n_hm_bufs = 3 if (vmem_cap > 64 * 1024 * 1024 and n_steps >= 8) else 2
    if n_hm_bufs > 2:
        hm_spec = pl.BlockSpec((row_tile, HW), lambda i: (i, 0),
                               pipeline_mode=pl.Buffered(n_hm_bufs))
    else:
        hm_spec = pl.BlockSpec((row_tile, HW), lambda i: (i, 0))

    coords_bytes = 8 * _round_up(HW, 128) * 4
    out_bytes = row_tile * 128 * 4            # (row_tile, 8) lane-pads to 128
    vmem_limit = (n_hm_bufs * row_tile * bytes_per_row_in     # pipelined input
                  + 2 * row_tile * bytes_per_row_f32          # f32 hm / exp work
                  + 2 * coords_bytes + 2 * out_bytes
                  + (8 << 20))                                # Mosaic scratch headroom
    vmem_limit = int(max(32 << 20, min(vmem_ceiling, vmem_limit)))

    kernel = functools.partial(_soft_argmax_kernel,
                               temperature=float(temperature))
    out = pl.pallas_call(
        kernel,
        out_shape=jax.ShapeDtypeStruct((R_pad, 8), jnp.float32),
        grid=(n_steps,),
        in_specs=[
            hm_spec,
            pl.BlockSpec((8, HW), lambda i: (0, 0)),
        ],
        out_specs=pl.BlockSpec((row_tile, 8), lambda i: (i, 0)),
        compiler_params=pltpu.CompilerParams(
            dimension_semantics=("parallel",),
            vmem_limit_bytes=vmem_limit),
    )(flat, coords)
    return out[:R, 0:2].reshape(B, K, 2)


# ----------------------------------------------------------------------------
# Kernel 2: project 3D points under T candidate poses and count (mask-weighted)
#           reprojection inliers per pose. Hypothesis axis T lives on lanes.
# ----------------------------------------------------------------------------
def _score_kernel(pts_ref, uvm_ref, pose_ref, out_ref, *, thresh2, eps):
    pts = pts_ref[...]                       # (N_pad, 8): [x, y, z, 1, 0...]
    uvm = uvm_ref[...]                       # (N_pad, 8): [u, v, mask, 0...]
    u0, v0, w = uvm[:, 0:1], uvm[:, 1:2], uvm[:, 2:3]

    # Camera-frame coordinates for every (point, hypothesis) pair: one small
    # MXU matmul per output coordinate replaces the broadcast VPU FMA chain.
    Xc = jnp.dot(pts, pose_ref[0], preferred_element_type=jnp.float32)   # (N_pad, T)
    Yc = jnp.dot(pts, pose_ref[1], preferred_element_type=jnp.float32)
    Zc = jnp.dot(pts, pose_ref[2], preferred_element_type=jnp.float32)

    valid = Zc > eps                                      # in front of camera
    inv_z = pl.reciprocal(jnp.maximum(Zc, eps), approx=True)   # EUP, not VALU
    du = FX * Xc * inv_z + (CX - u0)
    dv = FY * Yc * inv_z + (CY - v0)
    err2 = du * du + dv * dv                              # squared error (no sqrt)
    inlier = jnp.where(jnp.logical_and(err2 < thresh2, valid), w, 0.0)
    out_ref[...] = jnp.sum(inlier, axis=0, keepdims=True)  # (1, T_tile)


def count_inliers(points_3d, points_2d, mask, Rs, ts, thresh=INLIER_THRESH):
    """points_3d (N,3), points_2d (N,2), mask (N,), Rs (T,3,3), ts (T,3) -> (T,)."""
    N = points_3d.shape[0]
    T = Rs.shape[0]
    N_pad = _round_up(max(N, 8), 8)
    T_pad = _round_up(max(T, _T_TILE), _T_TILE)

    pts = jnp.zeros((N_pad, 8), jnp.float32)              # homogeneous [x,y,z,1]
    pts = pts.at[:N, 0:3].set(points_3d.astype(jnp.float32))
    pts = pts.at[:N, 3].set(1.0)                          # padding rows stay 0

    uvm = jnp.zeros((N_pad, 8), jnp.float32)              # [u, v, mask]
    uvm = uvm.at[:N, 0:2].set(points_2d.astype(jnp.float32))
    uvm = uvm.at[:N, 2].set(mask.astype(jnp.float32))

    # poseM[c, 0:4, t] = [R_t[c,0], R_t[c,1], R_t[c,2], t_t[c]]
    # so camera coordinate c of point n under pose t is (pts @ poseM[c])[n, t].
    M = jnp.concatenate([Rs.astype(jnp.float32),
                         ts.astype(jnp.float32)[:, :, None]], axis=-1)   # (T, 3, 4)
    poseM = jnp.zeros((3, 8, T_pad), jnp.float32)
    poseM = poseM.at[:, 0:4, :T].set(jnp.transpose(M, (1, 2, 0)))

    kernel = functools.partial(_score_kernel,
                               thresh2=float(thresh) ** 2, eps=_Z_EPS)
    out = pl.pallas_call(
        kernel,
        out_shape=jax.ShapeDtypeStruct((1, T_pad), jnp.float32),
        grid=(T_pad // _T_TILE,),
        in_specs=[
            pl.BlockSpec((N_pad, 8), lambda j: (0, 0)),
            pl.BlockSpec((N_pad, 8), lambda j: (0, 0)),
            pl.BlockSpec((3, 8, _T_TILE), lambda j: (0, 0, j)),
        ],
        out_specs=pl.BlockSpec((1, _T_TILE), lambda j: (0, j)),
        compiler_params=pltpu.CompilerParams(
            dimension_semantics=("parallel",)),
    )(pts, uvm, poseM)
    return out[0, :T]


# ----------------------------------------------------------------------------
# Glue (pure JAX, fully on-device / jittable): hypothesis generation + select.
# ----------------------------------------------------------------------------
def _rodrigues(rvec):
    theta = jnp.linalg.norm(rvec) + 1e-12
    k = rvec / theta
    zero = jnp.zeros((), jnp.float32)
    K = jnp.stack([
        jnp.stack([zero, -k[2], k[1]]),
        jnp.stack([k[2], zero, -k[0]]),
        jnp.stack([-k[1], k[0], zero]),
    ])
    return (jnp.eye(3, dtype=jnp.float32)
            + jnp.sin(theta) * K
            + (1.0 - jnp.cos(theta)) * (K @ K))


@functools.partial(jax.jit, static_argnames=("times",))
def pnp_forward(pred_heatmaps, target_landmarks, times=10):
    """Mirrors PnP_layer.forward. Returns (4,4) transform + per-pose scores."""
    B, K, H, W = pred_heatmaps.shape
    landmarks_mask = target_landmarks[:, :, 0].reshape(B * K)
    # landmarks_2d_gt = target_landmarks[:, :, 1:3]   # unused for the result
    landmarks_3d = target_landmarks[:, :, 3:6].reshape(B * K, 3)

    # --- soft-argmax (Pallas) ---
    landmarks_2d = spatial_soft_argmax2d(pred_heatmaps)            # (B, K, 2)
    p2d = landmarks_2d.reshape(B * K, 2)

    # --- deterministic pose hypotheses (in lieu of cv2.solvePnP) ---
    key = jax.random.PRNGKey(0)
    k_r, k_t = jax.random.split(key)
    rvecs = 0.1 * jax.random.normal(k_r, (times, 3), dtype=jnp.float32)
    tvecs = (jnp.array([0.0, 0.0, 5.0], dtype=jnp.float32)[None, :]
             + 0.05 * jax.random.normal(k_t, (times, 3), dtype=jnp.float32))
    Rs = jax.vmap(_rodrigues)(rvecs)                               # (T, 3, 3)

    # --- reprojection scoring, mask applied in-kernel (Pallas) ---
    scores = count_inliers(landmarks_3d, p2d, landmarks_mask, Rs, tvecs)

    # --- select best hypothesis on device, assemble 4x4 transform ---
    best = jnp.argmax(scores)
    Tr = jnp.eye(4, dtype=jnp.float32)
    Tr = Tr.at[:3, :3].set(Rs[best])
    Tr = Tr.at[:3, 3].set(tvecs[best])
    return Tr, scores


# ----------------------------------------------------------------------------
if __name__ == "__main__":
    B, K, H, W = 2, 8, 16, 16
    times = 10
    key = jax.random.PRNGKey(0)
    k_hm, k_2d, k_3d = jax.random.split(key, 3)

    pred_heatmaps = jax.random.normal(k_hm, (B, K, H, W), dtype=jnp.float32)

    mask = jnp.ones((B, K, 1), dtype=jnp.float32)                  # all valid
    lm2d_gt = jax.random.uniform(k_2d, (B, K, 2), dtype=jnp.float32) * (W - 1)
    lm3d = jax.random.normal(k_3d, (B, K, 3), dtype=jnp.float32)
    target_landmarks = jnp.concatenate([mask, lm2d_gt, lm3d], axis=-1)  # (B,K,6)

    # --- correctness spot-check of the soft-argmax kernel vs plain JAX ---
    lm2d = jax.block_until_ready(spatial_soft_argmax2d(pred_heatmaps))
    p_ref = jax.nn.softmax(pred_heatmaps.reshape(B * K, H * W) * TEMPERATURE, -1)
    ys_r, xs_r = np.mgrid[0:H, 0:W]
    xs_r = jnp.asarray(xs_r.reshape(-1), jnp.float32)
    ys_r = jnp.asarray(ys_r.reshape(-1), jnp.float32)
    ref_xy = jnp.stack([p_ref @ xs_r, p_ref @ ys_r], axis=-1).reshape(B, K, 2)
    assert bool(jnp.allclose(lm2d, ref_xy, atol=5e-2)), "soft-argmax mismatch"

    # --- full forward ---
    Tr, counts = pnp_forward(pred_heatmaps, target_landmarks, times=times)
    Tr = jax.block_until_ready(Tr)
    counts = jax.block_until_ready(counts)

    assert Tr.shape == (4, 4)
    assert counts.shape == (times,)
    assert bool(jnp.all(jnp.isfinite(Tr)))
    assert bool(jnp.all(jnp.isfinite(counts)))
    print("KERNEL_OK")
</pallas_src>

<mosaic_0001>
module attributes {stable_mosaic.version = 11 : i64} {
  func.func @_soft_argmax_kernel(%arg0: i32, %arg1: memref<8x256xf32, #tpu.memory_space<vmem>>, %arg2: memref<8x256xf32, #tpu.memory_space<vmem>>, %arg3: memref<8x8xf32, #tpu.memory_space<vmem>>) attributes {dimension_semantics = [#tpu.dimension_semantics<parallel>], iteration_bounds = array<i64: 2>, scalar_prefetch = 0 : i64, scratch_operands = 0 : i64, tpu.core_type = #tpu.core_type<tc>, window_params = [{transform_indices = @transform_0, window_bounds = array<i64: 8, 256>}, {pipeline_mode = #tpu.pipeline_mode<synchronous>, transform_indices = @transform_1, window_bounds = array<i64: 8, 256>}, {transform_indices = @transform_2, window_bounds = array<i64: 8, 8>}]} {
    %c0 = arith.constant 0 : index
    %c0_0 = arith.constant 0 : index
    %0 = vector.load %arg1[%c0, %c0_0] : memref<8x256xf32, #tpu.memory_space<vmem>>, vector<8x256xf32>
    %cst = arith.constant 1.000000e+01 : f32
    %1 = vector.broadcast %cst : f32 to vector<8x256xf32>
    %2 = arith.mulf %0, %1 : vector<8x256xf32>
    %cst_1 = arith.constant dense<0xFF800000> : vector<8xf32>
    %3 = vector.multi_reduction <maximumf>, %2, %cst_1 [1] : vector<8x256xf32> to vector<8xf32>
    %4 = vector.shape_cast %3 : vector<8xf32> to vector<8x1xf32>
    %5 = vector.broadcast %4 : vector<8x1xf32> to vector<8x256xf32>
    %6 = arith.subf %2, %5 : vector<8x256xf32>
    %7 = math.exp %6 : vector<8x256xf32>
    %c0_2 = arith.constant 0 : index
    %c0_3 = arith.constant 0 : index
    %8 = vector.load %arg2[%c0_2, %c0_3] : memref<8x256xf32, #tpu.memory_space<vmem>>, vector<8x256xf32>
    %cst_4 = arith.constant dense<0.000000e+00> : vector<8x8xf32>
    %9 = tpu.matmul %7, %8, %cst_4 {dimension_numbers = #tpu.dot_dimension_numbers<[1], [1], [0], [0], [0, 0, 1, 0], [], []>} : vector<8x256xf32>, vector<8x256xf32>, vector<8x8xf32> -> vector<8x8xf32>
    %10 = vector.extract_strided_slice %9 {offsets = [0, 2], sizes = [8, 1], strides = [1, 1]} : vector<8x8xf32> to vector<8x1xf32>
    %11 = tpu.reciprocal %10 {approx = true} : vector<8x1xf32> -> vector<8x1xf32>
    %12 = vector.broadcast %11 : vector<8x1xf32> to vector<8x8xf32>
    %13 = arith.mulf %9, %12 : vector<8x8xf32>
    %c0_5 = arith.constant 0 : index
    %c0_6 = arith.constant 0 : index
    %14 = vector.load %arg3[%c0_5, %c0_6] : memref<8x8xf32, #tpu.memory_space<vmem>>, vector<8x8xf32>
    tpu.vector_store %arg3[%c0_5, %c0_6], %13 {strides = array<i32>} : memref<8x8xf32, #tpu.memory_space<vmem>>, vector<8x8xf32>,
    return
  }
  func.func @transform_0(%arg0: i32) -> (i32, i32) {
    %c0_i32 = arith.constant 0 : i32
    %c0_i32_0 = arith.constant 0 : i32
    return %arg0, %c0_i32 : i32, i32
  }
  func.func @transform_1(%arg0: i32) -> (i32, i32) {
    %c0_i32 = arith.constant 0 : i32
    %c0_i32_0 = arith.constant 0 : i32
    %c0_i32_1 = arith.constant 0 : i32
    return %c0_i32, %c0_i32_0 : i32, i32
  }
  func.func @transform_2(%arg0: i32) -> (i32, i32) {
    %c0_i32 = arith.constant 0 : i32
    %c0_i32_0 = arith.constant 0 : i32
    return %arg0, %c0_i32 : i32, i32
  }
}

</mosaic_0001>

<bundles_post_ra>
// kernel: tpu_custom_call.1
= control target key start
LH: loop header
LB: loop body
LE: loop exit
PB: predicated region body
PF: predicated region fallthrough
CT: control target
= control target key end

     0   :  { %7 = vsyncpa [#allocation3], 0  ;;  %s678_s0 = inlined_call_operand.hbm [shape: f32[16,256], index: 0, kind: input, shape index: {}]   ;;  %s679_s1 = inlined_call_operand.hbm [shape: f32[8,256], index: 1, kind: input, shape index: {}]   ;;  %s680_s2 = inlined_call_operand.vmem [shape: f32[16,8], index: 2, kind: output, shape index: {}]  }
   0x1   :  { %9 = vsyncpa [#allocation3 + $0x1], 0 }
   0x2   :  { %10 = vsyncpa [#allocation5], 0  ;;  %s530_s9 = smov 0   ;;  %s532_s10 = smov 0  }
   0x3   :  { %s534_s11 = smov 0   ;;  %s536_s12 = smov 0  }
   0x4 LB: > { %s549_s13 = sadd.s32 4294967295, %s510_s12   ;;  %p36_p0 = scmp.ne.s32.totalorder %s502_s10, %s498_s9  ;;  %s510_s12 = sphi %s536_s12, %s698_s12   ;;  %s506_s11 = sphi %s534_s11, %s697_s11   ;;  %s502_s10 = sphi %s532_s10, %s696_s10   ;;  %s498_s9 = sphi %s530_s9, %s695_s9  }
   0x5   : > { %p681_p1 = scmp.eq.s32.totalorder %s549_s13, 0  ;;  %p343_p2 = scmp.ge.s32.totalorder %s510_s12, 1 }
   0x6   : > { %p94_p3 = scmp.lt.s32.totalorder %s510_s12, 3  ;;  %s512_s16 = smov [#allocation4]  }
   0x7   : > { %p557_p4 = por %p681_p1, %p36_p0  ;;  %s107_s17 = sshll.u32 %s512_s16, 4  ;;  %s108_s17 = int_to_ptr.vmem [resolvable:$true] %s107_s17 }
   0x8   : > { %p561_p5 = pnand %p343_p2, %p94_p3  ;;  %s568_s18 = sadd.s32 1, %s510_s12  }
   0x9   : > { %s684_s14 = scalar_select %p557_p4, 1, 0 }
   0xa   : > { %s685_s15 = scalar_select %p561_p5, 1, 0 }
   0xb   : > { %p362_p6 = pneg %p561_p5  ;;  %s20_s20 = ssub.s32 %s510_s12, %s568_s18 }
   0xc   : > { %p578_p8 = scmp.eq.s32.totalorder %s20_s20, 0  ;;  %s23_s22 = sadd.s32 1, %s506_s11 }
   0xd   : > { %p572_p7 = pnand %p362_p6, %p681_p1  ;;  %s414_s25 = scalar_lea.hbm %s679_s1, 256 }
   0xe   : > { %s687_s21 = scalar_select %p578_p8, 1, 0 }
   0xf   : > { %p415_p10 = scmp.ne.s32.totalorder %s679_s1, %s414_s25  ;;  %p416_p11 = pneg %p572_p7 }
  0x10   : > { %p421_p0 = scmp.lt.u32.totalorder %s414_s25, %s679_s1 }
  0x11   : > { %p417_p12 = pnand %p416_p11, %p415_p10 }
  0x13   : > { %p418_p13 = pneg %p417_p12 }
  0x15   : > { %p423_p2 = pnand %p421_p0, %p418_p13 }
  0x17   : > { %426 = shalt.err (!%p423_p2)
}
  0x18   : > { %s427_s30 = scalar_lea.vmem %s108_s17, 256  ;;  %p435_p9 = scmp.lt.s32.totalorder %s108_s17, %s108_s17 }
  0x19   : > { %p428_p3 = scmp.ne.s32.totalorder %s108_s17, %s427_s30  ;;  %p436_p4 = scmp.lt.s32.totalorder %s427_s30, %s427_s30 }
  0x1b   : > { %p430_p6 = pnand %p428_p3, %p416_p11  ;;  %p437_p5 = por %p436_p4, %p435_p9 }
  0x1d   : > { %p431_p1 = pneg %p430_p6 }
  0x1f   : > { %p438_p8 = pnand %p437_p5, %p431_p1 }
  0x21   : > { %441 = shalt.err (!%p438_p8)
}
  0x22   : > { %365 = dma.hbm_to_vmem [thread:$0]  (!%p572_p7), %s679_s1, 256, %s108_s17, [#allocation5]  }
  0x23   : > { %p688_p10 = scmp.ne.s32.totalorder %s687_s21, 0  ;;  %p31_p4 = scmp.eq.s32.totalorder %s510_s12, 0 }
  0x24   : > { %p371_p1 = scmp.lt.s32.totalorder %s510_s12, 2  ;;  %s118_s6 = sand.u32 1, %s506_s11  }
  0x25   : > { %s604_s5 = scalar_select %p688_p10, %s506_s11, %s23_s22  }
  0x26   : > { %s355_s7 = sshll.u32 %s510_s12, 8  ;;  %p689_p5 = scmp.ne.s32.totalorder %s506_s11, %s502_s10 }
  0x27   : > { %s346_s8 = sshll.u32 %s118_s6, 4  ;;  %s616_s19 = scalar_lea.hbm %s678_s0, %s355_s7 }
  0x28   : > { %p32_p8 = por %p31_p4, %p689_p5  ;;  %s122_s20 = scalar_lea.vmem [#allocation2], %s346_s8 }
  0x29   : > { %s130_s12 = sshll.u32 %s122_s20, 4  ;;  %s119_s21 = scalar_lea.sflag [#allocation3], %s118_s6  ;;  %s622_s12 = int_to_ptr.vmem [resolvable:$true] %s130_s12 }
  0x2a   : > { %p618_p7 = pnand %p371_p1, %p32_p8  ;;  %s442_s22 = scalar_lea.hbm %s616_s19, 256 }
  0x2b   : > { %p443_p9 = scmp.ne.s32.totalorder %s616_s19, %s442_s22  ;;  %s447_s25 = scalar_lea.hbm %s678_s0, 512 }
  0x2c   : > { %p444_p11 = pneg %p618_p7  ;;  %p448_p0 = scmp.lt.u32.totalorder %s616_s19, %s678_s0 }
  0x2d   : > { %p449_p2 = scmp.lt.u32.totalorder %s447_s25, %s442_s22  ;;  %p451_p6 = scmp.lt.u32.totalorder %s442_s22, %s616_s19 }
  0x2e   : > { %p445_p12 = pnand %p444_p11, %p443_p9 }
  0x2f   : > { %p450_p3 = por %p449_p2, %p448_p0 }
  0x30   : > { %p446_p13 = pneg %p445_p12 }
  0x31   : > { %p452_p10 = por %p451_p6, %p450_p3 }
  0x33   : > { %p453_p4 = pnand %p452_p10, %p446_p13 }
  0x35   : > { %456 = shalt.err (!%p453_p4)
}
  0x36   : > { %s457_s28 = scalar_lea.vmem %s622_s12, 256  ;;  %s513_s29 = smov [#allocation2]  }
  0x37   : > { %p458_p1 = scmp.ne.s32.totalorder %s622_s12, %s457_s28  ;;  %s462_s30 = sshll.u32 %s513_s29, 4  ;;  %s463_s30 = int_to_ptr.vmem [resolvable:$false] %s462_s30 }
  0x38   : > { %s464_s3 = scalar_lea.vmem %s463_s30, 512  ;;  %p465_p9 = scmp.lt.s32.totalorder %s622_s12, %s463_s30 }
  0x39   : > { %p460_p5 = pnand %p458_p1, %p444_p11  ;;  %p466_p12 = scmp.lt.s32.totalorder %s464_s3, %s457_s28 }
  0x3b   : > { %p461_p8 = pneg %p460_p5  ;;  %p467_p0 = por %p466_p12, %p465_p9 }
  0x3d   : > { %p468_p2 = pnand %p467_p0, %p461_p8 }
  0x3f   : > { %471 = shalt.err (!%p468_p2)
}
  0x40   : > { %369 = dma.hbm_to_vmem [thread:$0]  (!%p618_p7), %s616_s19, 256, %s622_s12, %s119_s21  }
  0x41   : > { %p691_p13 = scmp.ne.s32.totalorder %s685_s15, 0 }
  0x42   : > { %s141_s4 = sand.u32 (!%p691_p13), 1, %s502_s10   ;;  %p692_p11 = scmp.ne.s32.totalorder (!%p691_p13), %s684_s14, 0 }
  0x43   : > { %139 = sbr.rel (%p691_p13) target bundleno = 596 (0x254), region = 28  ;;  %s350_s6 = sshll.u32 (!%p691_p13), %s141_s4, 4 }
  0x44   : > { %s142_s7 = scalar_lea.sflag (!%p691_p13), [#allocation3], %s141_s4  ;;  %s145_s8 = scalar_lea.vmem (!%p691_p13), [#allocation2], %s350_s6 }
  0x4a   : > { %489 = dma.done.wait (%p692_p11), %s142_s7, 256  }
  0x4b   : > { %491 = vsyncadd (%p692_p11), %s142_s7, 4294967040  ;;  %p693_p3 = scmp.eq.s32.totalorder %s549_s13, 0 }
  0x4d   : > { %493 = dma.done.wait (%p693_p3), [#allocation5], 256   ;;  %p694_p6 = pmov %p693_p3 }
  0x4e   : > { %v173_v0 = vld [vmem:[%s145_s8] sm:$0xff]  ;;  %v174_v1 = vld [vmem:[%s145_s8 + $0x8] sm:$0xff]  ;;  %v514_v14 = vmov 2   ;;  %p169_p7 = scmp.lt.s32.totalorder %s549_s13, 1  ;;  %vm265_vm0 = vcmask 64512  }
  0x4f   : > { %495 = vsyncadd (%p694_p6), [#allocation5], 4294967040  ;;  %v175_v2 = vmul.f32 10.0, %v173_v0  ;;  %v176_v3 = vmul.f32 10.0, %v174_v1  ;;  %v187_v5 = vld [vmem:[#allocation4 + $0x8] sm:$0xff]  ;;  %v186_v6 = vld [vmem:[#allocation4] sm:$0xff]  ;;  %407 = vset.pattern.permute.xlu0 %v514_v14 }
  0x50   : > { %188 = vmatprep.subr.mxu0 %v187_v5  ;;  %s700_s13 = smov (!%p169_p7, %s549_s13), 1 }
  0x51   : > { %v177_v4 = vmax.f32 %v175_v2, %v176_v3  ;;  %189 = vmatpush1.xpose.msra.mxu0 %v186_v6  ;;  %s352_s14 = sshll.u32 %s700_s13, 3 }
  0x52   : > { %s172_s16 = scalar_lea.vmem %s680_s2, %s352_s14 }
  0x53   : > { %178 = vmax.xlane.f32.xlu0 %v177_v4 }
  0xe0   : > { %v179_v7 = vpop.xlane.xlu0 %178 }
  0xe1   : > { %v180_v8 = vsub.f32 %v175_v2, %v179_v7  ;;  %v181_v9 = vsub.f32 %v176_v3, %v179_v7 }
  0xe3   : > { %v182_v10 = vmul.f32 1.442695, %v180_v8  ;;  %v184_v11 = vmul.f32 1.442695, %v181_v9 }
  0xe5   : > { %408 = vpow2.f32 %v182_v10 }
  0xe6   : > { %410 = vpow2.f32 %v184_v11 }
  0xef   : > { %v409_v12 = vpop.eup %408 }
  0xf0   : > { %v411_v13 = vpop.eup %410 }
  0xf1   : > { %252 = vmatprep.mubr.f32.mxu0 %v411_v13 }
  0xf2   : > { %253 = vmatmul.mubr.f32.vlgmr.msra.gmra.mrb[0].mxu0 %v409_v12 }
 0x1c5   : > { %v254_v15 = vpop.f32.mrb[0].mxu0 }
 0x1c6   : > { %412 = vrcp.f32 %v254_v15  ;;  %v256_v16 = vpop.f32.mrb[1].mxu0 }
 0x1d0   : > { %v413_v17 = vpop.eup %412 }
 0x1d1   : > { %261 = vperm.xlu0 %407, %v413_v17  }
 0x250   : > { %v262_v18 = vpop.permute.xlu0 %261 }
 0x251   : > { %v264_v19 = vmul.f32 %v262_v18, %v254_v15 }
 0x253   : > { %266 = vst.msk [vmem:[%s172_s16] sm:$0xff] %vm265_vm0, %v264_v19 }
 0x254 PF: > { %p13_p10 = scmp.ge.s32.totalorder %s568_s18, 4   ;;  %s695_s9 = smov %s502_s10 }
 0x255   : > { %s696_s10 = smov %s506_s11  ;;  %s697_s11 = smov %s604_s5 }
 0x256   : > { %s698_s12 = smov %s568_s18  ;;  %15 = sbr.rel (!%p13_p10) target bundleno = 4 (0x4), region = 72 }
 0x25d   :  { %286 = vsyncpa [#allocation3], 1 }
 0x25e   :  { %288 = vsyncpa [#allocation3 + $0x1], 1 }
 0x25f   :  { %289 = vsyncpa [#allocation5], 1 }

</bundles_post_ra>
